<compile_context>
chip_gen: v5e
topology: v5e:2x2
jax: 0.10.0
libtpu: 0.0.40
codegen_flags: <defaults>
</compile_context>

<pallas_src>
import functools

import jax
import jax.numpy as jnp
from jax.experimental import pallas as pl
from jax.experimental.pallas import tpu as pltpu

_LANE = 128
_SUBLANE = 8
_TILE_ROWS = 4096             # (4096,128) f32 tile = 2 MiB per input per buffer
_SINGLE_SHOT_MAX_ROWS = 2048  # <= 1 MiB per input -> one un-gridded invocation


def _recip_or_100(sum_sq, n_elems):
    """(1,1) f32 sum of squares -> 1/mean, or 100 if mean == 0 (inf-free)."""
    loss = sum_sq / jnp.float32(n_elems)
    safe = jnp.where(loss != 0.0, loss, jnp.float32(1.0))
    return jnp.where(loss != 0.0, jnp.float32(1.0) / safe, jnp.float32(100.0))


def _mse_recip_single_kernel(x_ref, y_ref, o_ref, *, n_elems):
    d = x_ref[...].astype(jnp.float32) - y_ref[...].astype(jnp.float32)
    sum_sq = jnp.sum(d * d).reshape(1, 1)
    o_ref[...] = _recip_or_100(sum_sq, n_elems)


def _mse_recip_tiled_kernel(x_ref, y_ref, o_ref, acc_ref, *,
                            n_elems, n_rows, tile_rows):
    i = pl.program_id(0)

    @pl.when(i == 0)
    def _():
        acc_ref[...] = jnp.zeros_like(acc_ref)

    d = x_ref[...].astype(jnp.float32) - y_ref[...].astype(jnp.float32)
    d2 = d * d

    # Mask rows past the end of the input (only the last tile can overrun).
    # This code is only emitted when statically required.
    if n_rows % tile_rows != 0:
        row_ids = i * tile_rows + jax.lax.broadcasted_iota(
            jnp.int32, (tile_rows, _LANE), 0)
        d2 = jnp.where(row_ids < n_rows, d2, jnp.float32(0.0))

    # Pure-VPU accumulation: fold the tile into an (8,128) vreg accumulator.
    # The expensive cross-lane (XLU) reduce happens once, in the final step.
    acc_ref[...] += d2.reshape(-1, _SUBLANE, _LANE).sum(axis=0)

    @pl.when(i == pl.num_programs(0) - 1)
    def _():
        sum_sq = jnp.sum(acc_ref[...]).reshape(1, 1)
        o_ref[...] = _recip_or_100(sum_sq, n_elems)


def mse_loss_dissimilarity_encouraged(x, x_hat):
    """Returns a scalar: 1 / MSE(x, x_hat), or 100 if the MSE is exactly 0."""
    assert x.shape == x_hat.shape, "x and x_hat must have identical shapes"
    n_elems = x.size

    xf = x.reshape(-1)
    yf = x_hat.reshape(-1)

    # Lane-align.  For typical NN tensors (size % 128 == 0) this is a no-op;
    # otherwise both inputs get an identical small zero pad so the tail
    # contributes (0 - 0)^2 == 0 (the mean still divides by the true count).
    rem = n_elems % _LANE
    if rem != 0:
        pad = _LANE - rem
        xf = jnp.pad(xf, (0, pad))
        yf = jnp.pad(yf, (0, pad))

    rows = xf.shape[0] // _LANE
    x2d = xf.reshape(rows, _LANE)
    y2d = yf.reshape(rows, _LANE)

    if rows <= _SINGLE_SHOT_MAX_ROWS:
        # Whole problem fits comfortably in VMEM: one invocation, no grid
        # loop, no scratch accumulator, no phase branches.
        out = pl.pallas_call(
            functools.partial(_mse_recip_single_kernel, n_elems=n_elems),
            out_shape=jax.ShapeDtypeStruct((1, 1), jnp.float32),
        )(x2d, y2d)
        return out[0, 0]

    # Large inputs: streaming grid reduction with big lane-dense tiles.
    grid = (pl.cdiv(rows, _TILE_ROWS),)
    out = pl.pallas_call(
        functools.partial(_mse_recip_tiled_kernel, n_elems=n_elems,
                          n_rows=rows, tile_rows=_TILE_ROWS),
        out_shape=jax.ShapeDtypeStruct((1, 1), jnp.float32),
        grid_spec=pltpu.PrefetchScalarGridSpec(
            num_scalar_prefetch=0,
            grid=grid,
            in_specs=[
                pl.BlockSpec((_TILE_ROWS, _LANE), lambda i: (i, 0)),
                pl.BlockSpec((_TILE_ROWS, _LANE), lambda i: (i, 0)),
            ],
            out_specs=pl.BlockSpec((1, 1), lambda i: (0, 0)),
            scratch_shapes=[pltpu.VMEM((_SUBLANE, _LANE), jnp.float32)],
        ),
        compiler_params=pltpu.CompilerParams(
            dimension_semantics=("arbitrary",),
        ),
    )(x2d, y2d)
    return out[0, 0]


if __name__ == "__main__":
    key = jax.random.PRNGKey(0)
    k1, k2, k3, k4, k5, k6 = jax.random.split(key, 6)

    def ref_fn(a, b):
        mse = jnp.mean((a.astype(jnp.float32) - b.astype(jnp.float32)) ** 2)
        return jnp.where(mse != 0.0, 1.0 / mse, jnp.float32(100.0))

    # Primary workload: NCHW (2, 4, 16, 16) like the PyTorch module.
    x = jax.random.normal(k1, (2, 4, 16, 16), dtype=jnp.float32)
    x_hat = jax.random.normal(k2, (2, 4, 16, 16), dtype=jnp.float32)
    result = mse_loss_dissimilarity_encouraged(x, x_hat)
    jax.block_until_ready(result)
    assert jnp.allclose(result, ref_fn(x, x_hat), rtol=1e-5, atol=1e-6), (
        result, ref_fn(x, x_hat))

    # Degenerate case: identical inputs -> MSE == 0 -> returns 100.
    same = mse_loss_dissimilarity_encouraged(x, x)
    jax.block_until_ready(same)
    assert jnp.allclose(same, 100.0), same

    # Element count not divisible by 128 (exercises the lane-pad path).
    a = jax.random.normal(k3, (2, 3, 7, 11), dtype=jnp.float32)
    b = jax.random.normal(k4, (2, 3, 7, 11), dtype=jnp.float32)
    r2 = mse_loss_dissimilarity_encouraged(a, b)
    jax.block_until_ready(r2)
    assert jnp.allclose(r2, ref_fn(a, b), rtol=1e-5, atol=1e-6), (r2, ref_fn(a, b))

    # Larger input exercising the tiled streaming path + row-tail mask
    # (9000 rows -> grid=(3,), last tile has 808 valid rows).
    c = jax.random.normal(k5, (3, 3, 1000, 128), dtype=jnp.float32)
    d = jax.random.normal(k6, (3, 3, 1000, 128), dtype=jnp.float32)
    r3 = mse_loss_dissimilarity_encouraged(c, d)
    jax.block_until_ready(r3)
    assert jnp.allclose(r3, ref_fn(c, d), rtol=5e-4, atol=1e-6), (r3, ref_fn(c, d))

    print("KERNEL_OK")
</pallas_src>

<mosaic_0001>
module attributes {stable_mosaic.version = 11 : i64} {
  func.func @_mse_recip_single_kernel(%arg0: memref<16x128xf32, #tpu.memory_space<vmem>>, %arg1: memref<16x128xf32, #tpu.memory_space<vmem>>, %arg2: memref<1x1xf32, #tpu.memory_space<vmem>>) attributes {dimension_semantics = [], scalar_prefetch = 0 : i64, scratch_operands = 0 : i64, tpu.core_type = #tpu.core_type<tc>} {
    %c0 = arith.constant 0 : index
    %c0_0 = arith.constant 0 : index
    %0 = vector.load %arg0[%c0, %c0_0] : memref<16x128xf32, #tpu.memory_space<vmem>>, vector<16x128xf32>
    %c0_1 = arith.constant 0 : index
    %c0_2 = arith.constant 0 : index
    %1 = vector.load %arg1[%c0_1, %c0_2] : memref<16x128xf32, #tpu.memory_space<vmem>>, vector<16x128xf32>
    %2 = arith.subf %0, %1 : vector<16x128xf32>
    %3 = arith.mulf %2, %2 : vector<16x128xf32>
    %4 = vector.shape_cast %3 : vector<16x128xf32> to vector<1x16x128xf32>
    %cst = arith.constant dense<0.000000e+00> : vector<1xf32>
    %5 = vector.multi_reduction <add>, %4, %cst [1, 2] : vector<1x16x128xf32> to vector<1xf32>
    %6 = vector.shape_cast %5 : vector<1xf32> to vector<1x1x1xf32>
    %7 = vector.extract %6[0, 0, 0] : f32 from vector<1x1x1xf32>
    %8 = vector.broadcast %7 : f32 to vector<1x1xf32>
    %cst_3 = arith.constant 2.048000e+03 : f32
    %9 = vector.broadcast %cst_3 : f32 to vector<1x1xf32>
    %10 = arith.divf %8, %9 : vector<1x1xf32>
    %cst_4 = arith.constant 0.000000e+00 : f32
    %11 = vector.broadcast %cst_4 : f32 to vector<1x1xf32>
    %12 = arith.cmpf one, %10, %11 : vector<1x1xf32>
    %cst_5 = arith.constant 1.000000e+00 : f32
    %13 = vector.broadcast %cst_5 : f32 to vector<1x1xf32>
    %14 = arith.select %12, %10, %13 : vector<1x1xi1>, vector<1x1xf32>
    %cst_6 = arith.constant 0.000000e+00 : f32
    %15 = vector.broadcast %cst_6 : f32 to vector<1x1xf32>
    %16 = arith.cmpf one, %10, %15 : vector<1x1xf32>
    %cst_7 = arith.constant 1.000000e+00 : f32
    %17 = vector.broadcast %cst_7 : f32 to vector<1x1xf32>
    %18 = arith.divf %17, %14 : vector<1x1xf32>
    %cst_8 = arith.constant 1.000000e+02 : f32
    %19 = vector.broadcast %cst_8 : f32 to vector<1x1xf32>
    %20 = arith.select %16, %18, %19 : vector<1x1xi1>, vector<1x1xf32>
    %c0_9 = arith.constant 0 : index
    %c0_10 = arith.constant 0 : index
    %21 = vector.load %arg2[%c0_9, %c0_10] : memref<1x1xf32, #tpu.memory_space<vmem>>, vector<1x1xf32>
    tpu.vector_store %arg2[%c0_9, %c0_10], %20 {strides = array<i32>} : memref<1x1xf32, #tpu.memory_space<vmem>>, vector<1x1xf32>,
    return
  }
}

</mosaic_0001>

<bundles_post_ra>
// kernel: tpu_custom_call.1
= control target key start
LH: loop header
LB: loop body
LE: loop exit
PB: predicated region body
PF: predicated region fallthrough
CT: control target
= control target key end

     0   :  { %7 = vsyncpa [#allocation3], 0  ;;  %s231_s0 = inlined_call_operand.hbm [shape: f32[16,128], index: 0, kind: input, shape index: {}]   ;;  %s232_s1 = inlined_call_operand.hbm [shape: f32[16,128], index: 1, kind: input, shape index: {}]   ;;  %s233_s2 = inlined_call_operand.hbm [shape: f32[1,1], index: 2, kind: output, shape index: {}]  }
   0x1   :  { %8 = vsyncpa [#allocation6], 0 }
   0x2   :  { %9 = vsyncpa [#allocation4], 0  ;;  %s14_s11 = sshll.u32 %s231_s0, 4  ;;  %s199_s12 = smov [#allocation2]   ;;  %s15_s11 = int_to_ptr.hbm [resolvable:$true] %s14_s11 }
   0x3   :  { %s16_s13 = sshll.u32 %s199_s12, 4  ;;  %s27_s16 = sshll.u32 %s232_s1, 4  ;;  %s17_s13 = int_to_ptr.vmem [resolvable:$true] %s16_s13  ;;  %s28_s16 = int_to_ptr.hbm [resolvable:$true] %s27_s16 }
   0x4   :  { %s200_s17 = smov 128   ;;  %s201_s18 = smov 8  }
   0x5   :  { %22 = dma.hbm_to_vmem [thread:$0]  %s15_s11, 256, %s17_s13, [#allocation3], %s200_s17, %s200_s17, %s201_s18  }
   0x6   :  { %s202_s19 = smov [#allocation5]  }
   0x7   :  { %s29_s20 = sshll.u32 %s202_s19, 4  ;;  %s30_s20 = int_to_ptr.vmem [resolvable:$true] %s29_s20 }
   0x8   :  { %35 = dma.hbm_to_vmem [thread:$0]  %s28_s16, 256, %s30_s20, [#allocation6], %s200_s17, %s200_s17, %s201_s18  }
   0x9   :  { %193 = dma.done.wait [#allocation3], 256  }
   0xa   :  { %194 = vsyncadd [#allocation3], 4294967040 }
   0xb   :  { %195 = dma.done.wait [#allocation6], 256  }
   0xc   :  { %196 = vsyncadd [#allocation6], 4294967040  ;;  %v44_v0 = vld [vmem:[#allocation2] sm:$0xff]  ;;  %v45_v1 = vld [vmem:[#allocation2 + $0x8] sm:$0xff]  ;;  %v203_v16 = vmov 2048.0   ;;  %s204_s1 = smov [#allocation7]  }
   0xd   :  { %v46_v2 = vld [vmem:[#allocation5] sm:$0xff]  ;;  %v47_v3 = vld [vmem:[#allocation5 + $0x8] sm:$0xff]  ;;  %117 = vrcp.f32 %v203_v16  ;;  %s96_s21 = sshll.u32 %s204_s1, 4  ;;  %s98_s24 = sshll.u32 %s233_s2, 4  ;;  %vm89_vm6 = vcmask 0   ;;  %s97_s21 = int_to_ptr.vmem [resolvable:$true] %s96_s21  ;;  %s99_s24 = int_to_ptr.hbm [resolvable:$true] %s98_s24 }
   0xe   :  { %v48_v4 = vsub.f32 %v44_v0, %v46_v2  ;;  %v49_v5 = vsub.f32 %v45_v1, %v47_v3 }
  0x10   :  { %v50_v6 = vmul.f32 %v48_v4, %v48_v4  ;;  %v51_v7 = vmul.f32 %v49_v5, %v49_v5 }
  0x12   :  { %v52_v8 = vadd.f32 %v51_v7, %v50_v6 }
  0x13   :  { %v118_v17 = vpop.eup %117 }
  0x14   :  { %53 = vadd.xlane.f32.xlu0 %v52_v8  ;;  %v64_v18 = vmul.f32 2048.0, %v118_v17  ;;  %vm68_vm0 = vweird.f32 %v118_v17 }
  0x16   :  { %v65_v19 = vsub.f32 1.0, %v64_v18 }
  0x18   :  { %v66_v20 = vmul.f32 %v118_v17, %v65_v19 }
  0x1a   :  { %v67_v21 = vadd.f32 %v118_v17, %v66_v20 }
  0x1c   :  { %v69_v22 = vsel %vm68_vm0, %v118_v17, %v67_v21 }
  0x87   :  { %v54_v9 = vpop.xlane.xlu0 %53 }
  0x88   :  { %v55_v10 = vrot.slane %v54_v9, 4 }
  0x8a   :  { %v56_v11 = vadd.f32 %v55_v10, %v54_v9 }
  0x8c   :  { %v57_v12 = vrot.slane %v56_v11, 2 }
  0x8e   :  { %v58_v13 = vadd.f32 %v57_v12, %v56_v11 }
  0x90   :  { %v59_v14 = vrot.slane %v58_v13, 1 }
  0x92   :  { %v60_v15 = vadd.f32 %v59_v14, %v58_v13 }
  0x94   :  { %109 = vpush %v60_v15 }
  0xc5   :  { %s110_s0 = spop %109 }
  0xc6   :  { %v62_v23 = vstv %s110_s0 }
  0xc7   :  { %v70_v24 = vmul.f32 %v69_v22, %v62_v23 }
  0xc9   :  { %vm71_vm1 = vcmp.ne.f32.partialorder %v70_v24, 0.0 }
  0xca   :  { %v72_v25 = vsel %vm71_vm1, %v70_v24, 1.0 }
  0xcb   :  { %119 = vrcp.f32 %v72_v25  ;;  %v84_v29 = vand.u32 2147483648, %v72_v25  ;;  %v82_v31 = vand.u32 2147483647, %v72_v25  ;;  %vm78_vm3 = vweird.f32 %v72_v25 }
  0xcd   :  { %v85_v33 = vor.u32 1.1754944e-38, %v84_v29  ;;  %vm83_vm5 = vcmp.eq.f32.partialorder %v82_v31, 8.507059e+37 }
  0xd1   :  { %v120_v26 = vpop.eup %119 }
  0xd2   :  { %v74_v27 = vmul.f32 %v120_v26, %v72_v25  ;;  %vm79_vm2 = vweird.f32 %v120_v26 }
  0xd3   :  { %vm80_vm4 = vmor %vm78_vm3, %vm79_vm2 }
  0xd4   :  { %v75_v28 = vsub.f32 1.0, %v74_v27 }
  0xd6   :  { %v76_v30 = vmul.f32 %v120_v26, %v75_v28 }
  0xd8   :  { %v77_v32 = vadd.f32 %v120_v26, %v76_v30 }
  0xda   :  { %v81_v34 = vsel %vm80_vm4, %v120_v26, %v77_v32 }
  0xdb   :  { %v86_v35 = vsel %vm83_vm5, %v85_v33, %v81_v34 }
  0xdc   :  { %v88_v36 = vsel %vm71_vm1, %v86_v35, 100.0 }
  0xdd   :  { %90 = vst.msk [vmem:[#allocation7] sm:$0x1] %vm89_vm6, %v88_v36 }
  0xde   :  { %101 = dma.vmem_to_hbm [thread:$0]  %s97_s21, 16, %s99_s24, [#allocation4]  }
  0xdf   :  { %197 = dma.done.wait [#allocation4], 16  }
  0xe0   :  { %198 = vsyncadd [#allocation4], 4294967280 }
  0xe1   :  { %106 = vsyncpa [#allocation3], 1 }
  0xe2   :  { %107 = vsyncpa [#allocation6], 1 }
  0xe3   :  { %108 = vsyncpa [#allocation4], 1 }

</bundles_post_ra>
